<compile_context>
chip_gen: v6e
topology: v6e:2x2x1
jax: 0.10.0
libtpu: 0.0.40
codegen_flags: <defaults>
</compile_context>

<pallas_src>
from functools import partial

import jax
import jax.numpy as jnp
from jax import lax
from jax.experimental import pallas as pl
from jax.experimental.pallas import tpu as pltpu


# --------------------------------------------------------------------- kernel

def _bottleneck_kernel(x_ref, w1_ref, b1_ref, w2_ref, b2_ref, w3_ref, b3_ref,
                       o_ref, tpad_ref, *, H, W, P):
    """Fused bottleneck for one batch element, all intermediates in VMEM.

    Layouts (lane-dense (H, W*C) row slabs):
      x_ref    : (1, H, W*Cin)  f32   Cin == 4*P (also the residual)
      w1_ref   : (W*Cin, W*P)   bf16  block-diagonal 1x1 conv, bn1 scale folded
      w2_ref   : (7, W*P, W*P)  bf16  per-kh Toeplitz over kw, bn2 scale folded
      w3_ref   : (W*P, W*4P)    bf16  block-diagonal 1x1 conv, bn3 scale folded
      b*_ref   : (1, W*C)       f32   folded BN biases tiled over W
      o_ref    : (1, H, W*4P)   f32
      tpad_ref : (H+6, W*P)     f32   scratch: vertically zero-padded conv2 input
    """
    x = x_ref[0]                                   # (H, W*Cin) f32, kept for residual
    xb = x.astype(jnp.bfloat16)

    # ---- conv1 (1x1) + bn1 + relu : one block-diagonal matmul ---------------
    t1 = jnp.dot(xb, w1_ref[...], preferred_element_type=jnp.float32)
    t1 = jnp.maximum(t1 + b1_ref[...], 0.0)        # (H, W*P)

    # ---- stage conv2 input in a vertically zero-padded VMEM scratch ---------
    # (kw padding is already encoded in the Toeplitz weights, only kh needs a halo)
    tpad_ref[...] = jnp.zeros_like(tpad_ref)
    tpad_ref[3:3 + H, :] = t1

    # ---- conv2 (7x7, pad 3) + bn2 + relu : 7 Toeplitz matmuls over kh -------
    acc = jnp.zeros((H, W * P), jnp.float32)
    for kh in range(7):                            # short unrolled loop, tiny acc
        lhs = tpad_ref[kh:kh + H, :].astype(jnp.bfloat16)
        acc += jnp.dot(lhs, w2_ref[kh], preferred_element_type=jnp.float32)
    t2 = jnp.maximum(acc + b2_ref[...], 0.0).astype(jnp.bfloat16)   # (H, W*P)

    # ---- conv3 (1x1) + bn3 + residual + relu : block-diagonal matmul --------
    y = jnp.dot(t2, w3_ref[...], preferred_element_type=jnp.float32)
    y = y + b3_ref[...] + x                        # residual add in f32
    o_ref[0] = jnp.maximum(y, 0.0).astype(o_ref.dtype)   # lane-dense (16,256) store


# ------------------------------------------------------------------- wrappers

def _fold_bn(gamma, beta, mean, var, eps=1e-5):
    scale = gamma / jnp.sqrt(var + eps)
    bias = beta - mean * scale
    return scale.astype(jnp.float32), bias.astype(jnp.float32)


def bottleneck1_forward(x_nchw, params):
    """Bottleneck1.forward (stride=1, downsample=None => inplanes == 4*planes)."""
    N, Cin, H, W = x_nchw.shape
    P = params["conv1_w"].shape[0]          # planes
    C4 = 4 * P
    assert Cin == C4, "downsample=None requires inplanes == 4*planes"

    s1, b1 = _fold_bn(*params["bn1"])
    s2, b2 = _fold_bn(*params["bn2"])
    s3, b3 = _fold_bn(*params["bn3"])

    # Activations as lane-dense (H, W*C) row slabs (NHWC with last 2 dims merged).
    x2 = jnp.transpose(x_nchw, (0, 2, 3, 1)).reshape(N, H, W * Cin).astype(jnp.float32)

    eye = jnp.eye(W, dtype=jnp.float32)

    # conv1 as block-diagonal (W*Cin, W*P); bn1 scale folded into the weight.
    w1f = (params["conv1_w"][:, :, 0, 0] * s1[:, None]).T              # (Cin, P)
    w1blk = jnp.einsum("wv,cp->wcvp", eye, w1f).reshape(W * Cin, W * P)

    # conv2 as per-kh Toeplitz over kw (7, W*P, W*P); kw zero-padding implicit.
    wi = jnp.arange(W)[:, None, None]
    wo = jnp.arange(W)[None, :, None]
    kw = jnp.arange(7)[None, None, :]
    sel = (wi - wo + 3 == kw).astype(jnp.float32)                      # (W, W, 7)
    w2f = params["conv2_w"] * s2[:, None, None, None]                  # (P, P, 7, 7)
    w2toe = jnp.einsum("abk,ochk->hacbo", sel, w2f).reshape(7, W * P, W * P)

    # conv3 as block-diagonal (W*P, W*C4); bn3 scale folded into the weight.
    w3f = (params["conv3_w"][:, :, 0, 0] * s3[:, None]).T              # (P, C4)
    w3blk = jnp.einsum("wv,pc->wpvc", eye, w3f).reshape(W * P, W * C4)

    b1r = jnp.tile(b1, W).reshape(1, W * P)
    b2r = jnp.tile(b2, W).reshape(1, W * P)
    b3r = jnp.tile(b3, W).reshape(1, W * C4)

    out2 = pl.pallas_call(
        partial(_bottleneck_kernel, H=H, W=W, P=P),
        out_shape=jax.ShapeDtypeStruct((N, H, W * C4), jnp.float32),
        grid=(N,),
        in_specs=[
            pl.BlockSpec((1, H, W * Cin), lambda b: (b, 0, 0)),
            pl.BlockSpec((W * Cin, W * P), lambda b: (0, 0)),
            pl.BlockSpec((1, W * P), lambda b: (0, 0)),
            pl.BlockSpec((7, W * P, W * P), lambda b: (0, 0, 0)),
            pl.BlockSpec((1, W * P), lambda b: (0, 0)),
            pl.BlockSpec((W * P, W * C4), lambda b: (0, 0)),
            pl.BlockSpec((1, W * C4), lambda b: (0, 0)),
        ],
        out_specs=pl.BlockSpec((1, H, W * C4), lambda b: (b, 0, 0)),
        scratch_shapes=[pltpu.VMEM((H + 6, W * P), jnp.float32)],
        compiler_params=pltpu.CompilerParams(
            dimension_semantics=("parallel",)),
    )(x2,
      w1blk.astype(jnp.bfloat16), b1r,
      w2toe.astype(jnp.bfloat16), b2r,
      w3blk.astype(jnp.bfloat16), b3r)

    return jnp.transpose(out2.reshape(N, H, W, C4), (0, 3, 1, 2))       # back to NCHW


# ------------------------------------------------------------------ reference

def _ref_forward(x, params):
    def bn(z, p):
        g, b, m, v = p
        s = g / jnp.sqrt(v + 1e-5)
        return z * s[None, :, None, None] + (b - m * s)[None, :, None, None]

    dn = ("NCHW", "OIHW", "NCHW")
    y = lax.conv_general_dilated(x, params["conv1_w"], (1, 1), "VALID",
                                 dimension_numbers=dn)
    y = jax.nn.relu(bn(y, params["bn1"]))
    y = lax.conv_general_dilated(y, params["conv2_w"], (1, 1), ((3, 3), (3, 3)),
                                 dimension_numbers=dn)
    y = jax.nn.relu(bn(y, params["bn2"]))
    y = lax.conv_general_dilated(y, params["conv3_w"], (1, 1), "VALID",
                                 dimension_numbers=dn)
    y = bn(y, params["bn3"])
    return jax.nn.relu(y + x)


# ----------------------------------------------------------------------- main

def _make_params(key, inplanes, planes):
    ks = jax.random.split(key, 15)
    n = lambda k, shape, s=0.1: (s * jax.random.normal(k, shape)).astype(jnp.float32)

    def bn_params(k0, k1, k2, k3, c):
        gamma = 1.0 + n(k0, (c,))
        beta = n(k1, (c,))
        mean = n(k2, (c,))
        var = 1.0 + jnp.abs(n(k3, (c,)))
        return (gamma, beta, mean, var)

    return {
        "conv1_w": n(ks[0], (planes, inplanes, 1, 1)),
        "bn1": bn_params(ks[1], ks[2], ks[3], ks[4], planes),
        "conv2_w": n(ks[5], (planes, planes, 7, 7)),
        "bn2": bn_params(ks[6], ks[7], ks[8], ks[9], planes),
        "conv3_w": n(ks[10], (planes * 4, planes, 1, 1)),
        "bn3": bn_params(ks[11], ks[12], ks[13], ks[14], planes * 4),
    }


if __name__ == "__main__":
    key = jax.random.PRNGKey(0)
    k_x, k_p = jax.random.split(key)

    planes = 4
    inplanes = planes * 4          # residual add requires inplanes == 4*planes
    N, H, W = 2, 16, 16

    x = jax.random.normal(k_x, (N, inplanes, H, W), dtype=jnp.float32)
    params = _make_params(k_p, inplanes, planes)

    out = jax.jit(bottleneck1_forward)(x, params)
    jax.block_until_ready(out)
    assert out.shape == (N, 4 * planes, H, W)

    ref = _ref_forward(x, params)
    assert jnp.allclose(out, ref, atol=3e-2, rtol=3e-2), (
        f"max abs err = {jnp.max(jnp.abs(out - ref))}")
    print("KERNEL_OK")
</pallas_src>

<mosaic_0001>
module attributes {stable_mosaic.version = 11 : i64} {
  func.func @_bottleneck_kernel(%arg0: i32, %arg1: memref<1x16x256xf32, #tpu.memory_space<vmem>>, %arg2: memref<256x64xbf16, #tpu.memory_space<vmem>>, %arg3: memref<1x64xf32, #tpu.memory_space<vmem>>, %arg4: memref<7x64x64xbf16, #tpu.memory_space<vmem>>, %arg5: memref<1x64xf32, #tpu.memory_space<vmem>>, %arg6: memref<64x256xbf16, #tpu.memory_space<vmem>>, %arg7: memref<1x256xf32, #tpu.memory_space<vmem>>, %arg8: memref<1x16x256xf32, #tpu.memory_space<vmem>>, %arg9: memref<22x64xf32, #tpu.memory_space<vmem>>) attributes {dimension_semantics = [#tpu.dimension_semantics<parallel>], iteration_bounds = array<i64: 2>, scalar_prefetch = 0 : i64, scratch_operands = 1 : i64, tpu.core_type = #tpu.core_type<tc>, window_params = [{transform_indices = @transform_0, window_bounds = array<i64: 1, 16, 256>}, {pipeline_mode = #tpu.pipeline_mode<synchronous>, transform_indices = @transform_1, window_bounds = array<i64: 256, 64>}, {pipeline_mode = #tpu.pipeline_mode<synchronous>, transform_indices = @transform_2, window_bounds = array<i64: 1, 64>}, {pipeline_mode = #tpu.pipeline_mode<synchronous>, transform_indices = @transform_3, window_bounds = array<i64: 7, 64, 64>}, {pipeline_mode = #tpu.pipeline_mode<synchronous>, transform_indices = @transform_4, window_bounds = array<i64: 1, 64>}, {pipeline_mode = #tpu.pipeline_mode<synchronous>, transform_indices = @transform_5, window_bounds = array<i64: 64, 256>}, {pipeline_mode = #tpu.pipeline_mode<synchronous>, transform_indices = @transform_6, window_bounds = array<i64: 1, 256>}, {transform_indices = @transform_7, window_bounds = array<i64: 1, 16, 256>}]} {
    %c0 = arith.constant 0 : index
    %c0_0 = arith.constant 0 : index
    %c0_1 = arith.constant 0 : index
    %0 = vector.load %arg1[%c0, %c0_0, %c0_1] : memref<1x16x256xf32, #tpu.memory_space<vmem>>, vector<1x16x256xf32>
    %1 = vector.shape_cast %0 : vector<1x16x256xf32> to vector<16x256xf32>
    %2 = arith.truncf %1 : vector<16x256xf32> to vector<16x256xbf16>
    %c0_2 = arith.constant 0 : index
    %c0_3 = arith.constant 0 : index
    %3 = vector.load %arg2[%c0_2, %c0_3] : memref<256x64xbf16, #tpu.memory_space<vmem>>, vector<256x64xbf16>
    %cst = arith.constant dense<0.000000e+00> : vector<16x64xf32>
    %4 = tpu.matmul %2, %3, %cst {dimension_numbers = #tpu.dot_dimension_numbers<[1], [0], [0], [1], [0, 0, 1, 1], [], []>} : vector<16x256xbf16>, vector<256x64xbf16>, vector<16x64xf32> -> vector<16x64xf32>
    %c0_4 = arith.constant 0 : index
    %c0_5 = arith.constant 0 : index
    %5 = vector.load %arg3[%c0_4, %c0_5] : memref<1x64xf32, #tpu.memory_space<vmem>>, vector<1x64xf32>
    %6 = vector.broadcast %5 : vector<1x64xf32> to vector<16x64xf32>
    %7 = arith.addf %4, %6 : vector<16x64xf32>
    %cst_6 = arith.constant 0.000000e+00 : f32
    %8 = vector.broadcast %cst_6 : f32 to vector<16x64xf32>
    %9 = arith.maximumf %7, %8 : vector<16x64xf32>
    %cst_7 = arith.constant 0.000000e+00 : f32
    %10 = vector.broadcast %cst_7 : f32 to vector<22x64xf32>
    %c0_8 = arith.constant 0 : index
    %c0_9 = arith.constant 0 : index
    %11 = vector.load %arg9[%c0_8, %c0_9] : memref<22x64xf32, #tpu.memory_space<vmem>>, vector<22x64xf32>
    tpu.vector_store %arg9[%c0_8, %c0_9], %10 {strides = array<i32>} : memref<22x64xf32, #tpu.memory_space<vmem>>, vector<22x64xf32>,
    %c3 = arith.constant 3 : index
    %c0_10 = arith.constant 0 : index
    %12 = vector.load %arg9[%c3, %c0_10] : memref<22x64xf32, #tpu.memory_space<vmem>>, vector<16x64xf32>
    tpu.vector_store %arg9[%c3, %c0_10], %9 {strides = array<i32>} : memref<22x64xf32, #tpu.memory_space<vmem>>, vector<16x64xf32>,
    %cst_11 = arith.constant 0.000000e+00 : f32
    %13 = vector.broadcast %cst_11 : f32 to vector<16x64xf32>
    %c0_12 = arith.constant 0 : index
    %c0_13 = arith.constant 0 : index
    %14 = vector.load %arg9[%c0_12, %c0_13] : memref<22x64xf32, #tpu.memory_space<vmem>>, vector<16x64xf32>
    %15 = arith.truncf %14 : vector<16x64xf32> to vector<16x64xbf16>
    %c0_14 = arith.constant 0 : index
    %c0_15 = arith.constant 0 : index
    %c0_16 = arith.constant 0 : index
    %16 = vector.load %arg4[%c0_14, %c0_15, %c0_16] : memref<7x64x64xbf16, #tpu.memory_space<vmem>>, vector<1x64x64xbf16>
    %17 = vector.shape_cast %16 : vector<1x64x64xbf16> to vector<64x64xbf16>
    %cst_17 = arith.constant dense<0.000000e+00> : vector<16x64xf32>
    %18 = tpu.matmul %15, %17, %cst_17 {dimension_numbers = #tpu.dot_dimension_numbers<[1], [0], [0], [1], [0, 0, 1, 1], [], []>} : vector<16x64xbf16>, vector<64x64xbf16>, vector<16x64xf32> -> vector<16x64xf32>
    %19 = arith.addf %13, %18 : vector<16x64xf32>
    %c1 = arith.constant 1 : index
    %c0_18 = arith.constant 0 : index
    %20 = vector.load %arg9[%c1, %c0_18] : memref<22x64xf32, #tpu.memory_space<vmem>>, vector<16x64xf32>
    %21 = arith.truncf %20 : vector<16x64xf32> to vector<16x64xbf16>
    %c1_19 = arith.constant 1 : index
    %c0_20 = arith.constant 0 : index
    %c0_21 = arith.constant 0 : index
    %22 = vector.load %arg4[%c1_19, %c0_20, %c0_21] : memref<7x64x64xbf16, #tpu.memory_space<vmem>>, vector<1x64x64xbf16>
    %23 = vector.shape_cast %22 : vector<1x64x64xbf16> to vector<64x64xbf16>
    %cst_22 = arith.constant dense<0.000000e+00> : vector<16x64xf32>
    %24 = tpu.matmul %21, %23, %cst_22 {dimension_numbers = #tpu.dot_dimension_numbers<[1], [0], [0], [1], [0, 0, 1, 1], [], []>} : vector<16x64xbf16>, vector<64x64xbf16>, vector<16x64xf32> -> vector<16x64xf32>
    %25 = arith.addf %19, %24 : vector<16x64xf32>
    %c2 = arith.constant 2 : index
    %c0_23 = arith.constant 0 : index
    %26 = vector.load %arg9[%c2, %c0_23] : memref<22x64xf32, #tpu.memory_space<vmem>>, vector<16x64xf32>
    %27 = arith.truncf %26 : vector<16x64xf32> to vector<16x64xbf16>
    %c2_24 = arith.constant 2 : index
    %c0_25 = arith.constant 0 : index
    %c0_26 = arith.constant 0 : index
    %28 = vector.load %arg4[%c2_24, %c0_25, %c0_26] : memref<7x64x64xbf16, #tpu.memory_space<vmem>>, vector<1x64x64xbf16>
    %29 = vector.shape_cast %28 : vector<1x64x64xbf16> to vector<64x64xbf16>
    %cst_27 = arith.constant dense<0.000000e+00> : vector<16x64xf32>
    %30 = tpu.matmul %27, %29, %cst_27 {dimension_numbers = #tpu.dot_dimension_numbers<[1], [0], [0], [1], [0, 0, 1, 1], [], []>} : vector<16x64xbf16>, vector<64x64xbf16>, vector<16x64xf32> -> vector<16x64xf32>
    %31 = arith.addf %25, %30 : vector<16x64xf32>
    %c3_28 = arith.constant 3 : index
    %c0_29 = arith.constant 0 : index
    %32 = vector.load %arg9[%c3_28, %c0_29] : memref<22x64xf32, #tpu.memory_space<vmem>>, vector<16x64xf32>
    %33 = arith.truncf %32 : vector<16x64xf32> to vector<16x64xbf16>
    %c3_30 = arith.constant 3 : index
    %c0_31 = arith.constant 0 : index
    %c0_32 = arith.constant 0 : index
    %34 = vector.load %arg4[%c3_30, %c0_31, %c0_32] : memref<7x64x64xbf16, #tpu.memory_space<vmem>>, vector<1x64x64xbf16>
    %35 = vector.shape_cast %34 : vector<1x64x64xbf16> to vector<64x64xbf16>
    %cst_33 = arith.constant dense<0.000000e+00> : vector<16x64xf32>
    %36 = tpu.matmul %33, %35, %cst_33 {dimension_numbers = #tpu.dot_dimension_numbers<[1], [0], [0], [1], [0, 0, 1, 1], [], []>} : vector<16x64xbf16>, vector<64x64xbf16>, vector<16x64xf32> -> vector<16x64xf32>
    %37 = arith.addf %31, %36 : vector<16x64xf32>
    %c4 = arith.constant 4 : index
    %c0_34 = arith.constant 0 : index
    %38 = vector.load %arg9[%c4, %c0_34] : memref<22x64xf32, #tpu.memory_space<vmem>>, vector<16x64xf32>
    %39 = arith.truncf %38 : vector<16x64xf32> to vector<16x64xbf16>
    %c4_35 = arith.constant 4 : index
    %c0_36 = arith.constant 0 : index
    %c0_37 = arith.constant 0 : index
    %40 = vector.load %arg4[%c4_35, %c0_36, %c0_37] : memref<7x64x64xbf16, #tpu.memory_space<vmem>>, vector<1x64x64xbf16>
    %41 = vector.shape_cast %40 : vector<1x64x64xbf16> to vector<64x64xbf16>
    %cst_38 = arith.constant dense<0.000000e+00> : vector<16x64xf32>
    %42 = tpu.matmul %39, %41, %cst_38 {dimension_numbers = #tpu.dot_dimension_numbers<[1], [0], [0], [1], [0, 0, 1, 1], [], []>} : vector<16x64xbf16>, vector<64x64xbf16>, vector<16x64xf32> -> vector<16x64xf32>
    %43 = arith.addf %37, %42 : vector<16x64xf32>
    %c5 = arith.constant 5 : index
    %c0_39 = arith.constant 0 : index
    %44 = vector.load %arg9[%c5, %c0_39] : memref<22x64xf32, #tpu.memory_space<vmem>>, vector<16x64xf32>
    %45 = arith.truncf %44 : vector<16x64xf32> to vector<16x64xbf16>
    %c5_40 = arith.constant 5 : index
    %c0_41 = arith.constant 0 : index
    %c0_42 = arith.constant 0 : index
    %46 = vector.load %arg4[%c5_40, %c0_41, %c0_42] : memref<7x64x64xbf16, #tpu.memory_space<vmem>>, vector<1x64x64xbf16>
    %47 = vector.shape_cast %46 : vector<1x64x64xbf16> to vector<64x64xbf16>
    %cst_43 = arith.constant dense<0.000000e+00> : vector<16x64xf32>
    %48 = tpu.matmul %45, %47, %cst_43 {dimension_numbers = #tpu.dot_dimension_numbers<[1], [0], [0], [1], [0, 0, 1, 1], [], []>} : vector<16x64xbf16>, vector<64x64xbf16>, vector<16x64xf32> -> vector<16x64xf32>
    %49 = arith.addf %43, %48 : vector<16x64xf32>
    %c6 = arith.constant 6 : index
    %c0_44 = arith.constant 0 : index
    %50 = vector.load %arg9[%c6, %c0_44] : memref<22x64xf32, #tpu.memory_space<vmem>>, vector<16x64xf32>
    %51 = arith.truncf %50 : vector<16x64xf32> to vector<16x64xbf16>
    %c6_45 = arith.constant 6 : index
    %c0_46 = arith.constant 0 : index
    %c0_47 = arith.constant 0 : index
    %52 = vector.load %arg4[%c6_45, %c0_46, %c0_47] : memref<7x64x64xbf16, #tpu.memory_space<vmem>>, vector<1x64x64xbf16>
    %53 = vector.shape_cast %52 : vector<1x64x64xbf16> to vector<64x64xbf16>
    %cst_48 = arith.constant dense<0.000000e+00> : vector<16x64xf32>
    %54 = tpu.matmul %51, %53, %cst_48 {dimension_numbers = #tpu.dot_dimension_numbers<[1], [0], [0], [1], [0, 0, 1, 1], [], []>} : vector<16x64xbf16>, vector<64x64xbf16>, vector<16x64xf32> -> vector<16x64xf32>
    %55 = arith.addf %49, %54 : vector<16x64xf32>
    %c0_49 = arith.constant 0 : index
    %c0_50 = arith.constant 0 : index
    %56 = vector.load %arg5[%c0_49, %c0_50] : memref<1x64xf32, #tpu.memory_space<vmem>>, vector<1x64xf32>
    %57 = vector.broadcast %56 : vector<1x64xf32> to vector<16x64xf32>
    %58 = arith.addf %55, %57 : vector<16x64xf32>
    %cst_51 = arith.constant 0.000000e+00 : f32
    %59 = vector.broadcast %cst_51 : f32 to vector<16x64xf32>
    %60 = arith.maximumf %58, %59 : vector<16x64xf32>
    %61 = arith.truncf %60 : vector<16x64xf32> to vector<16x64xbf16>
    %c0_52 = arith.constant 0 : index
    %c0_53 = arith.constant 0 : index
    %62 = vector.load %arg6[%c0_52, %c0_53] : memref<64x256xbf16, #tpu.memory_space<vmem>>, vector<64x256xbf16>
    %cst_54 = arith.constant dense<0.000000e+00> : vector<16x256xf32>
    %63 = tpu.matmul %61, %62, %cst_54 {dimension_numbers = #tpu.dot_dimension_numbers<[1], [0], [0], [1], [0, 0, 1, 1], [], []>} : vector<16x64xbf16>, vector<64x256xbf16>, vector<16x256xf32> -> vector<16x256xf32>
    %c0_55 = arith.constant 0 : index
    %c0_56 = arith.constant 0 : index
    %64 = vector.load %arg7[%c0_55, %c0_56] : memref<1x256xf32, #tpu.memory_space<vmem>>, vector<1x256xf32>
    %65 = vector.broadcast %64 : vector<1x256xf32> to vector<16x256xf32>
    %66 = arith.addf %63, %65 : vector<16x256xf32>
    %67 = arith.addf %66, %1 : vector<16x256xf32>
    %cst_57 = arith.constant 0.000000e+00 : f32
    %68 = vector.broadcast %cst_57 : f32 to vector<16x256xf32>
    %69 = arith.maximumf %67, %68 : vector<16x256xf32>
    %c0_58 = arith.constant 0 : index
    %c0_59 = arith.constant 0 : index
    %c0_60 = arith.constant 0 : index
    %70 = vector.load %arg8[%c0_58, %c0_59, %c0_60] : memref<1x16x256xf32, #tpu.memory_space<vmem>>, vector<1x16x256xf32>
    %71 = vector.shape_cast %70 : vector<1x16x256xf32> to vector<16x256xf32>
    %72 = vector.shape_cast %69 : vector<16x256xf32> to vector<1x16x256xf32>
    tpu.vector_store %arg8[%c0_58, %c0_59, %c0_60], %72 {strides = array<i32>} : memref<1x16x256xf32, #tpu.memory_space<vmem>>, vector<1x16x256xf32>,
    return
  }
  func.func @transform_0(%arg0: i32) -> (i32, i32, i32) {
    %c0_i32 = arith.constant 0 : i32
    %c0_i32_0 = arith.constant 0 : i32
    %c0_i32_1 = arith.constant 0 : i32
    return %arg0, %c0_i32, %c0_i32_0 : i32, i32, i32
  }
  func.func @transform_1(%arg0: i32) -> (i32, i32) {
    %c0_i32 = arith.constant 0 : i32
    %c0_i32_0 = arith.constant 0 : i32
    %c0_i32_1 = arith.constant 0 : i32
    return %c0_i32, %c0_i32_0 : i32, i32
  }
  func.func @transform_2(%arg0: i32) -> (i32, i32) {
    %c0_i32 = arith.constant 0 : i32
    %c0_i32_0 = arith.constant 0 : i32
    %c0_i32_1 = arith.constant 0 : i32
    return %c0_i32, %c0_i32_0 : i32, i32
  }
  func.func @transform_3(%arg0: i32) -> (i32, i32, i32) {
    %c0_i32 = arith.constant 0 : i32
    %c0_i32_0 = arith.constant 0 : i32
    %c0_i32_1 = arith.constant 0 : i32
    %c0_i32_2 = arith.constant 0 : i32
    return %c0_i32, %c0_i32_0, %c0_i32_1 : i32, i32, i32
  }
  func.func @transform_4(%arg0: i32) -> (i32, i32) {
    %c0_i32 = arith.constant 0 : i32
    %c0_i32_0 = arith.constant 0 : i32
    %c0_i32_1 = arith.constant 0 : i32
    return %c0_i32, %c0_i32_0 : i32, i32
  }
  func.func @transform_5(%arg0: i32) -> (i32, i32) {
    %c0_i32 = arith.constant 0 : i32
    %c0_i32_0 = arith.constant 0 : i32
    %c0_i32_1 = arith.constant 0 : i32
    return %c0_i32, %c0_i32_0 : i32, i32
  }
  func.func @transform_6(%arg0: i32) -> (i32, i32) {
    %c0_i32 = arith.constant 0 : i32
    %c0_i32_0 = arith.constant 0 : i32
    %c0_i32_1 = arith.constant 0 : i32
    return %c0_i32, %c0_i32_0 : i32, i32
  }
  func.func @transform_7(%arg0: i32) -> (i32, i32, i32) {
    %c0_i32 = arith.constant 0 : i32
    %c0_i32_0 = arith.constant 0 : i32
    %c0_i32_1 = arith.constant 0 : i32
    return %arg0, %c0_i32, %c0_i32_0 : i32, i32, i32
  }
}

</mosaic_0001>

<bundles_post_ra>
// kernel: tile.28
= control target key start
LH: loop header
LB: loop body
LE: loop exit
PB: predicated region body
PF: predicated region fallthrough
CT: control target
= control target key end

     0   :  { %s28_s0 = inlined_call_operand.vmem [shape: f32[16], index: 0, kind: input, shape index: {}]   ;;  %s29_s1 = inlined_call_operand.vmem [shape: f32[16,16], index: 1, kind: output, shape index: {}]  }
   0x1   :  { %v4_v0 = vld [vmem:[%s28_s0] ss:$0 sm:$0xff] }
   0x2   :  { %5 = vst [vmem:[%s29_s1] sm:$0xff] %v4_v0  ;;  %8 = vst [vmem:[%s29_s1 + $0x8] sm:$0xff] %v4_v0 }

// kernel: tile.29
= control target key start
LH: loop header
LB: loop body
LE: loop exit
PB: predicated region body
PF: predicated region fallthrough
CT: control target
= control target key end

     0   :  { %s7_s6 = smov 3  ;;  %s21_s9 = smov 3  ;;  %vm4_vm0 = vcmask 130048   ;;  %vm11_vm1 = vcmask 1048448   ;;  %vm18_vm2 = vcmask 917248   ;;  %vm25_vm3 = vcmask 786048   ;;  %s131_s0 = inlined_call_operand.vmem [shape: f32[16,16], index: 0, kind: input, shape index: {}]   ;;  %s132_s1 = inlined_call_operand.vmem [shape: f32[1,256], index: 1, kind: output, shape index: {}]  }
   0x1   :  { %v69_v0 = vld [vmem:[%s131_s0 + $0x7] ss:$8 sm:%s7_s6]   ;;  %s84_s10 = smov 112   ;;  %v71_v1 = vld [vmem:[%s131_s0 + $0x5] ss:$8 sm:%s21_s9]   ;;  %s14_s13 = smov 3 }
   0x2   :  { %9 = vrot.lane.b32.xlu0 %v69_v0, %s84_s10  ;;  %s85_s14 = smov 80   ;;  %v70_v2 = vld [vmem:[%s131_s0 + $0x6] ss:$8 sm:%s14_s13]   ;;  %s28_s17 = smov 3  ;;  %vm32_vm4 = vcmask 654848   ;;  %vm39_vm5 = vcmask 523648  }
   0x3   :  { %23 = vrot.lane.b32.xlu1 %v71_v1, %s85_s14  ;;  %v72_v3 = vld [vmem:[%s131_s0 + $0x4] ss:$8 sm:%s28_s17]   ;;  %s35_s20 = smov 3  ;;  %s42_s21 = smov 3  ;;  %vm46_vm6 = vcmask 392448   ;;  %vm53_vm7 = vcmask 261248  }
   0x4   :  { %s86_s22 = smov 96   ;;  %s87_s23 = smov 64   ;;  %v73_v4 = vld [vmem:[%s131_s0 + $0x3] ss:$8 sm:%s35_s20]   ;;  %v74_v5 = vld [vmem:[%s131_s0 + $0x2] ss:$8 sm:%s42_s21]  }
   0x5   :  { %s2_s26 = smov 3  ;;  %s49_s29 = smov 3 }
   0x6   :  { %16 = vrot.lane.b32.xlu0 %v70_v2, %s86_s22  ;;  %v3_v6 = vld [vmem:[%s131_s0] ss:$8 sm:%s2_s26]   ;;  %s88_s3 = smov 48   ;;  %s89_s4 = smov 32  }
   0x7   :  { %30 = vrot.lane.b32.xlu1 %v72_v3, %s87_s23  ;;  %5 = vst.msk [vmem:[#allocation0] ss:$8 sm:$0x3] %vm4_vm0, %v3_v6   ;;  %v75_v7 = vld [vmem:[%s131_s0 + $0x1] ss:$8 sm:%s49_s29]   ;;  %s90_s0 = smov 16  }
   0xa   :  { %37 = vrot.lane.b32.xlu0 %v73_v4, %s88_s3 }
   0xb   :  { %44 = vrot.lane.b32.xlu1 %v74_v5, %s89_s4 }
   0xe   :  { %51 = vrot.lane.b32.xlu0 %v75_v7, %s90_s0 }
  0x74   :  { %v10_v8 = vpop.permute.xlu0 %9  }
  0x75   :  { %12 = vst.msk [vmem:[#allocation0] ss:$8 sm:$0x3] %vm11_vm1, %v10_v8   ;;  %v24_v9 = vpop.permute.xlu1 %23  }
  0x78   :  { %v17_v10 = vpop.permute.xlu0 %16  }
  0x79   :  { %19 = vst.msk [vmem:[#allocation0] ss:$8 sm:$0x3] %vm18_vm2, %v17_v10   ;;  %v31_v11 = vpop.permute.xlu1 %30  }
  0x7a   :  { %26 = vst.msk [vmem:[#allocation0] ss:$8 sm:$0x3] %vm25_vm3, %v24_v9  }
  0x7b   :  { %33 = vst.msk [vmem:[#allocation0] ss:$8 sm:$0x3] %vm32_vm4, %v31_v11  }
  0x7c   :  { %v38_v12 = vpop.permute.xlu0 %37  }
  0x7d   :  { %40 = vst.msk [vmem:[#allocation0] ss:$8 sm:$0x3] %vm39_vm5, %v38_v12   ;;  %v45_v13 = vpop.permute.xlu1 %44  }
  0x7e   :  { %47 = vst.msk [vmem:[#allocation0] ss:$8 sm:$0x3] %vm46_vm6, %v45_v13  }
  0x80   :  { %v52_v14 = vpop.permute.xlu0 %51  }
  0x81   :  { %54 = vst.msk [vmem:[#allocation0] ss:$8 sm:$0x3] %vm53_vm7, %v52_v14  }
  0x88   :  { %v59_v15 = vld [vmem:[#allocation0] sm:$0x1]  ;;  %v64_v16 = vld [vmem:[#allocation0 + $0x8] sm:$0x1] }
  0x89   :  { %62 = vst [vmem:[%s132_s1] sm:$0x1] %v59_v15  ;;  %76 = vst [vmem:[%s132_s1 + $0x1] sm:$0x1] %v64_v16 }

// kernel: tile.18
= control target key start
LH: loop header
LB: loop body
LE: loop exit
PB: predicated region body
PF: predicated region fallthrough
CT: control target
= control target key end

     0   :  { %s28_s0 = inlined_call_operand.vmem [shape: f32[4], index: 0, kind: input, shape index: {}]   ;;  %s29_s1 = inlined_call_operand.vmem [shape: f32[16,4], index: 1, kind: output, shape index: {}]  }
   0x1   :  { %v4_v0 = vld [vmem:[%s28_s0] ss:$0 sm:$0xff] }
   0x2   :  { %5 = vst [vmem:[%s29_s1] sm:$0xff] %v4_v0  ;;  %8 = vst [vmem:[%s29_s1 + $0x8] sm:$0xff] %v4_v0 }

// kernel: tile.19
= control target key start
LH: loop header
LB: loop body
LE: loop exit
PB: predicated region body
PF: predicated region fallthrough
CT: control target
= control target key end

     0   :  { %s133_s10 = smov 60   ;;  %s134_s11 = smov 52   ;;  %vm3_vm0 = vcmask 31744   ;;  %vm9_vm1 = vcmask 523744   ;;  %vm15_vm2 = vcmask 490944   ;;  %vm21_vm3 = vcmask 458144   ;;  %s209_s0 = inlined_call_operand.vmem [shape: f32[16,4], index: 0, kind: input, shape index: {}]   ;;  %s210_s1 = inlined_call_operand.vmem [shape: f32[1,64], index: 1, kind: output, shape index: {}]  }
   0x1   :  { %v103_v0 = vld [vmem:[%s209_s0 + $0xf] sm:$0x1]   ;;  %v105_v1 = vld [vmem:[%s209_s0 + $0xd] sm:$0x1]   ;;  %v104_v2 = vld [vmem:[%s209_s0 + $0xe] sm:$0x1]  }
   0x2   :  { %7 = vrot.lane.b32.xlu0 %v103_v0, %s133_s10  ;;  %19 = vrot.lane.b32.xlu1 %v105_v1, %s134_s11  ;;  %v106_v3 = vld [vmem:[%s209_s0 + $0xc] sm:$0x1]   ;;  %s135_s16 = smov 56   ;;  %s136_s17 = smov 48   ;;  %v107_v4 = vld [vmem:[%s209_s0 + $0xb] sm:$0x1]  }
   0x3   :  { %v108_v5 = vld [vmem:[%s209_s0 + $0xa] sm:$0x1]   ;;  %v2_v6 = vld [vmem:[%s209_s0] sm:$0x1]   ;;  %s137_s24 = smov 44   ;;  %s138_s25 = smov 40  }
   0x4   :  { %4 = vst.msk [vmem:[#allocation0] sm:$0x1] %vm3_vm0, %v2_v6   ;;  %v109_v7 = vld [vmem:[%s209_s0 + $0x9] sm:$0x1]   ;;  %v110_v8 = vld [vmem:[%s209_s0 + $0x8] sm:$0x1]  }
   0x5   :  { %s139_s30 = smov 36   ;;  %s140_s2 = smov 32   ;;  %v111_v9 = vld [vmem:[%s209_s0 + $0x7] sm:$0x1]   ;;  %v112_v10 = vld [vmem:[%s209_s0 + $0x6] sm:$0x1]  }
   0x6   :  { %13 = vrot.lane.b32.xlu0 %v104_v2, %s135_s16  ;;  %25 = vrot.lane.b32.xlu1 %v106_v3, %s136_s17  ;;  %s141_s7 = smov 28   ;;  %s142_s8 = smov 24   ;;  %v113_v11 = vld [vmem:[%s209_s0 + $0x5] sm:$0x1]   ;;  %v114_v12 = vld [vmem:[%s209_s0 + $0x4] sm:$0x1]  }
   0x7   :  { %s143_s13 = smov 20   ;;  %s144_s14 = smov 16   ;;  %v115_v13 = vld [vmem:[%s209_s0 + $0x3] sm:$0x1]   ;;  %v116_v14 = vld [vmem:[%s209_s0 + $0x2] sm:$0x1]  }
   0x8   :  { %s145_s19 = smov 12   ;;  %s146_s20 = smov 8   ;;  %v117_v15 = vld [vmem:[%s209_s0 + $0x1] sm:$0x1]   ;;  %vm27_vm4 = vcmask 425344   ;;  %vm33_vm5 = vcmask 392544  }
   0x9   :  { %s147_s0 = smov 4   ;;  %vm39_vm6 = vcmask 359744   ;;  %vm45_vm7 = vcmask 326944   ;;  %vm51_vm8 = vcmask 294144   ;;  %vm57_vm9 = vcmask 261344  }
   0xa   :  { %31 = vrot.lane.b32.xlu0 %v107_v4, %s137_s24  ;;  %37 = vrot.lane.b32.xlu1 %v108_v5, %s138_s25  ;;  %vm63_vm10 = vcmask 228544   ;;  %vm69_vm11 = vcmask 195744   ;;  %vm75_vm12 = vcmask 162944   ;;  %vm81_vm13 = vcmask 130144  }
   0xb   :  { %vm87_vm14 = vcmask 97344   ;;  %vm93_vm15 = vcmask 64544  }
   0xe   :  { %43 = vrot.lane.b32.xlu0 %v109_v7, %s139_s30  ;;  %49 = vrot.lane.b32.xlu1 %v110_v8, %s140_s2 }
  0x12   :  { %55 = vrot.lane.b32.xlu0 %v111_v9, %s141_s7  ;;  %61 = vrot.lane.b32.xlu1 %v112_v10, %s142_s8 }
  0x16   :  { %67 = vrot.lane.b32.xlu0 %v113_v11, %s143_s13  ;;  %73 = vrot.lane.b32.xlu1 %v114_v12, %s144_s14 }
  0x1a   :  { %79 = vrot.lane.b32.xlu0 %v115_v13, %s145_s19  ;;  %85 = vrot.lane.b32.xlu1 %v116_v14, %s146_s20 }
  0x1e   :  { %91 = vrot.lane.b32.xlu0 %v117_v15, %s147_s0 }
  0x74   :  { %v8_v16 = vpop.permute.xlu0 %7   ;;  %v20_v17 = vpop.permute.xlu1 %19  }
  0x75   :  { %10 = vst.msk [vmem:[#allocation0] sm:$0x1] %vm9_vm1, %v8_v16  }
  0x78   :  { %v14_v18 = vpop.permute.xlu0 %13   ;;  %v26_v19 = vpop.permute.xlu1 %25  }
  0x79   :  { %16 = vst.msk [vmem:[#allocation0] sm:$0x1] %vm15_vm2, %v14_v18  }
  0x7a   :  { %22 = vst.msk [vmem:[#allocation0] sm:$0x1] %vm21_vm3, %v20_v17  }
  0x7b   :  { %28 = vst.msk [vmem:[#allocation0] sm:$0x1] %vm27_vm4, %v26_v19  }
  0x7c   :  { %v32_v20 = vpop.permute.xlu0 %31   ;;  %v38_v21 = vpop.permute.xlu1 %37  }
  0x7d   :  { %34 = vst.msk [vmem:[#allocation0] sm:$0x1] %vm33_vm5, %v32_v20  }
  0x7e   :  { %40 = vst.msk [vmem:[#allocation0] sm:$0x1] %vm39_vm6, %v38_v21  }
  0x80   :  { %v44_v22 = vpop.permute.xlu0 %43   ;;  %v50_v23 = vpop.permute.xlu1 %49  }
  0x81   :  { %46 = vst.msk [vmem:[#allocation0] sm:$0x1] %vm45_vm7, %v44_v22  }
  0x82   :  { %52 = vst.msk [vmem:[#allocation0] sm:$0x1] %vm51_vm8, %v50_v23  }
  0x84   :  { %v56_v24 = vpop.permute.xlu0 %55   ;;  %v62_v25 = vpop.permute.xlu1 %61  }
  0x85   :  { %58 = vst.msk [vmem:[#allocation0] sm:$0x1] %vm57_vm9, %v56_v24  }
  0x86   :  { %64 = vst.msk [vmem:[#allocation0] sm:$0x1] %vm63_vm10, %v62_v25  }
  0x88   :  { %v68_v26 = vpop.permute.xlu0 %67   ;;  %v74_v27 = vpop.permute.xlu1 %73  }
  0x89   :  { %70 = vst.msk [vmem:[#allocation0] sm:$0x1] %vm69_vm11, %v68_v26  }
  0x8a   :  { %76 = vst.msk [vmem:[#allocation0] sm:$0x1] %vm75_vm12, %v74_v27  }
  0x8c   :  { %v80_v28 = vpop.permute.xlu0 %79   ;;  %v86_v29 = vpop.permute.xlu1 %85  }
  0x8d   :  { %82 = vst.msk [vmem:[#allocation0] sm:$0x1] %vm81_vm13, %v80_v28  }
  0x8e   :  { %88 = vst.msk [vmem:[#allocation0] sm:$0x1] %vm87_vm14, %v86_v29  }
  0x90   :  { %v92_v30 = vpop.permute.xlu0 %91  }
  0x91   :  { %94 = vst.msk [vmem:[#allocation0] sm:$0x1] %vm93_vm15, %v92_v30  }
  0x98   :  { %v99_v31 = vld [vmem:[#allocation0] sm:$0x1] }
  0x99   :  { %102 = vst [vmem:[%s210_s1] sm:$0x1] %v99_v31 }

// kernel: bottleneck1_forward.1
= control target key start
LH: loop header
LB: loop body
LE: loop exit
PB: predicated region body
PF: predicated region fallthrough
CT: control target
= control target key end

     0   :  { %s1607_s24 = smov 0   ;;  %s1869_s0 = inlined_call_operand.vmem [shape: f32[2,16,256], index: 0, kind: input, shape index: {}]   ;;  %s1870_s1 = inlined_call_operand.vmem [shape: bf16[256,64], index: 1, kind: input, shape index: {}]   ;;  %s1871_s2 = inlined_call_operand.vmem [shape: f32[1,64], index: 2, kind: input, shape index: {}]   ;;  %s1872_s3 = inlined_call_operand.vmem [shape: bf16[7,64,64], index: 3, kind: input, shape index: {}]   ;;  %s1873_s4 = inlined_call_operand.vmem [shape: f32[1,64], index: 4, kind: input, shape index: {}]   ;;  %s1874_s5 = inlined_call_operand.vmem [shape: bf16[64,256], index: 5, kind: input, shape index: {}]   ;;  %s1875_s6 = inlined_call_operand.vmem [shape: f32[1,256], index: 6, kind: input, shape index: {}]   ;;  %s1876_s7 = inlined_call_operand.vmem [shape: f32[2,16,256], index: 7, kind: output, shape index: {}]  }
   0x1 LB: > { %s1225_s25 = sadd.s32 4294967295, %s1562_s24   ;;  %p1229_p0 = scmp.ge.s32.totalorder %s1562_s24, 1  ;;  %s1562_s24 = sphi %s1607_s24, %s17_s24  }
   0x2   : > { %p237_p1 = scmp.lt.s32.totalorder %s1562_s24, 3 }
   0x4   : > { %p238_p2 = pnand %p1229_p0, %p237_p1 }
   0x5   : > { %p269_p3 = scmp.lt.s32.totalorder (!%p238_p2), %s1225_s25, 1 }
   0x6   : > { %241 = sbr.rel (%p238_p2) target bundleno = 720 (0x2d0), region = 48 }
   0xb   : > { %v1500_v0 = vld [vmem:[%s1870_s1 + $0x78] sm:$0xff]   ;;  %v1502_v2 = vld [vmem:[%s1870_s1 + $0x70] sm:$0xff]   ;;  %v1504_v4 = vld [vmem:[%s1870_s1 + $0x68] sm:$0xff]   ;;  %s1878_s25 = smov (!%p269_p3, %s1225_s25), 1  ;;  %v1564_v24 = vmov 0.0   ;;  %vm464_vm0 = vcmask 523264  }
   0xc   : > { %v1501_v1 = vld [vmem:[%s1870_s1 + $0x38] sm:$0xff]   ;;  %1348 = vmatprep.subr.bf16.mxu0 %v1500_v0  ;;  %v1503_v3 = vld [vmem:[%s1870_s1 + $0x30] sm:$0xff]   ;;  %v1505_v5 = vld [vmem:[%s1870_s1 + $0x28] sm:$0xff]   ;;  %s1346_s17 = sshll.u32 %s1878_s25, 5  ;;  %1405 = vmatprep.subr.bf16.mxu1 %v1564_v24  ;;  %465 = vst.msk [vmem:[#allocation2] sm:$0xff] %vm464_vm0, %v1564_v24  ;;  %vm467_vm1 = vcmask 521216  }
   0xd   : > { %1349 = vmatpush3.bf16.msra.mxu0 %v1501_v1  ;;  %v1506_v6 = vld [vmem:[%s1870_s1 + $0x60] sm:$0xff]   ;;  %v1508_v8 = vld [vmem:[%s1870_s1 + $0x58] sm:$0xff]   ;;  %s273_s26 = scalar_lea.vmem %s1869_s0, %s1346_s17  ;;  %v1510_v10 = vld [vmem:[%s1870_s1 + $0x50] sm:$0xff]   ;;  %466 = vst.msk [vmem:[#allocation2 + $0x8] sm:$0xff] %vm464_vm0, %v1564_v24  ;;  %vm1565_vm2 = vmmov 0   ;;  %s278_s19 = scalar_lea.vmem %s1876_s7, %s1346_s17 }
   0xe   : > { %1350 = vmatprep.subr.bf16.mxu0 %v1502_v2  ;;  %v1507_v7 = vld [vmem:[%s1870_s1 + $0x20] sm:$0xff]   ;;  %v1509_v9 = vld [vmem:[%s1870_s1 + $0x18] sm:$0xff]   ;;  %v1656_v11 = vld [vmem:[%s273_s26 + $0x8] sm:$0xff]  ;;  %468 = vst.msk [vmem:[#allocation2 + $0x10] sm:$0x3f] %vm467_vm1, %v1564_v24  ;;  %1413 = vmatprep.mubr.msk.bf16.mxu1 %vm1565_vm2, %v1564_v24 }
   0xf   : > { %v1658_v12 = vld [vmem:[%s273_s26 + $0x18] sm:$0xff]  ;;  %v1511_v13 = vld [vmem:[%s1870_s1 + $0x10] sm:$0xff]   ;;  %v1512_v15 = vld [vmem:[%s1870_s1 + $0x48] sm:$0xff]  }
  0x10   : > { %v285_v14 = vpack.c.bf16 %v1658_v12, %v1656_v11  ;;  %v1513_v16 = vld [vmem:[%s1870_s1 + $0x8] sm:$0xff]   ;;  %v1514_v17 = vld [vmem:[%s1870_s1 + $0x40] sm:$0xff]   ;;  %v1679_v20 = vld [vmem:[%s273_s26 + $0x10] sm:$0xff] }
  0x11   : > { %1351 = vmatpush3.bf16.msra.mxu0 %v1503_v3  ;;  %v1515_v18 = vld [vmem:[%s1870_s1] sm:$0xff]   ;;  %v1516_v22 = vld [vmem:[%s1872_s3 + $0x38] sm:$0xff]   ;;  %v1518_v25 = vld [vmem:[%s1872_s3 + $0x30] sm:$0xff]  }
  0x12   : > { %1352 = vmatprep.subr.bf16.mxu0 %v1504_v4  ;;  %453 = vmatprep.mubr.bf16.mxu0 %v285_v14  ;;  %v1677_v19 = vld [vmem:[%s273_s26] sm:$0xff]  ;;  %v1517_v23 = vld [vmem:[%s1872_s3 + $0x58] sm:$0xff]   ;;  %v1519_v26 = vld [vmem:[%s1872_s3 + $0x50] sm:$0xff]  }
  0x13   : > { %v284_v21 = vpack.c.bf16 %v1679_v20, %v1677_v19  ;;  %1406 = vmatpush3.bf16.msra.mxu1 %v1516_v22  ;;  %v1520_v27 = vld [vmem:[%s1872_s3 + $0x28] sm:$0xff]   ;;  %v1522_v29 = vld [vmem:[%s1872_s3 + $0x20] sm:$0xff]   ;;  %v1524_v43 = vld [vmem:[%s1872_s3 + $0x18] sm:$0xff]  }
  0x14   : > { %1407 = vmatprep.subr.bf16.mxu1 %v1564_v24  ;;  %v1521_v28 = vld [vmem:[%s1872_s3 + $0x48] sm:$0xff]   ;;  %v1523_v30 = vld [vmem:[%s1872_s3 + $0x40] sm:$0xff]   ;;  %v1525_v44 = vld [vmem:[%s1872_s3 + $0x98] sm:$0xff]  }
  0x15   : > { %1353 = vmatpush3.bf16.msra.mxu0 %v1505_v5  ;;  %v1234_v32 = vld [vmem:[%s1871_s2] ss:$0 sm:$0xff]  ;;  %v1526_v50 = vld [vmem:[%s1872_s3 + $0x10] sm:$0xff]   ;;  %v1528_v52 = vld [vmem:[%s1872_s3 + $0x8] sm:$0xff]  }
  0x16   : > { %1354 = vmatprep.subr.bf16.mxu0 %v1506_v6  ;;  %v1527_v51 = vld [vmem:[%s1872_s3 + $0x90] sm:$0xff]   ;;  %v1529_v53 = vld [vmem:[%s1872_s3 + $0x88] sm:$0xff]   ;;  %v1530_v54 = vld [vmem:[%s1872_s3] sm:$0xff]  }
  0x17   : > { %1408 = vmatpush3.bf16.msra.mxu1 %v1518_v25  ;;  %v1531_v55 = vld [vmem:[%s1872_s3 + $0x80] sm:$0xff]   ;;  %v1532_v60 = vld [vmem:[%s1872_s3 + $0x78] sm:$0xff]   ;;  %v1534_v0 = vld [vmem:[%s1872_s3 + $0x70] sm:$0xff]  }
  0x18   : > { %1409 = vmatprep.subr.bf16.mxu1 %v1564_v24  ;;  %v1533_v61 = vld [vmem:[%s1872_s3 + $0xd8] sm:$0xff]   ;;  %v1535_v1 = vld [vmem:[%s1872_s3 + $0xd0] sm:$0xff]   ;;  %v1536_v2 = vld [vmem:[%s1872_s3 + $0x68] sm:$0xff]  }
  0x19   : > { %1355 = vmatpush3.bf16.msra.mxu0 %v1507_v7  ;;  %v1537_v3 = vld [vmem:[%s1872_s3 + $0xc8] sm:$0xff]   ;;  %v1538_v4 = vld [vmem:[%s1872_s3 + $0x60] sm:$0xff]   ;;  %v1546_v25 = vld [vmem:[%s1874_s5 + $0x34] ss:$8 sps:$4 sm:$0xff]  }
  0x1a   : > { %1356 = vmatprep.subr.bf16.mxu0 %v1508_v8  ;;  %v1539_v5 = vld [vmem:[%s1872_s3 + $0xc0] sm:$0xff]  }
  0x1b   : > { %1410 = vmatpush3.bf16.msra.mxu1 %v1520_v27  ;;  %v1552_v27 = vld [vmem:[%s1874_s5 + $0x14] ss:$8 sps:$4 sm:$0xff]  }
  0x1c   : > { %1411 = vmatprep.subr.bf16.mxu1 %v1564_v24 }
  0x1d   : > { %1357 = vmatpush3.bf16.msra.mxu0 %v1509_v9 }
  0x1e   : > { %1358 = vmatprep.subr.bf16.mxu0 %v1510_v10  ;;  %v1540_v10 = vld [vmem:[%s1872_s3 + $0xb8] sm:$0xff]  }
  0x1f   : > { %1412 = vmatpush3.bf16.msra.mxu1 %v1522_v29  ;;  %v1555_v29 = vld [vmem:[%s1874_s5 + $0x4] ss:$8 sps:$4 sm:$0xff]  }
  0x20   : > { %1417 = vmatprep.subr.bf16.mxu1 %v1564_v24 }
  0x21   : > { %1359 = vmatpush3.bf16.msra.mxu0 %v1511_v13 }
  0x22   : > { %1360 = vmatprep.subr.bf16.mxu0 %v1512_v15  ;;  %v1541_v15 = vld [vmem:[%s1872_s3 + $0xb0] sm:$0xff]  }
  0x25   : > { %1361 = vmatpush3.bf16.msra.mxu0 %v1513_v16  ;;  %v1542_v16 = vld [vmem:[%s1872_s3 + $0xa8] sm:$0xff]  }
  0x26   : > { %1362 = vmatprep.subr.bf16.mxu0 %v1514_v17  ;;  %v1543_v17 = vld [vmem:[%s1872_s3 + $0xa0] sm:$0xff]  }
  0x29   : > { %1363 = vmatpush3.bf16.msra.mxu0 %v1515_v18 }
  0x2a   : > { %1429 = vmatprep.subr.bf16.mxu0 %v1564_v24 }
  0x2c   : > { %454 = vmatmul.mubr.bf16.vlgmr.msra.gmra.mxu0 %v284_v21 }
  0x2d   : > { %1430 = vmatpush3.bf16.msra.mxu0 %v1517_v23  ;;  %1437 = vmatprep.mubr.msk.bf16.mxu0 %vm1565_vm2, %v1564_v24  ;;  %v1544_v23 = vld [vmem:[%s1874_s5 + $0x30] ss:$8 sps:$4 sm:$0xff]  }
  0x2e   : > { %1431 = vmatprep.subr.bf16.mxu0 %v1564_v24 }
  0x31   : > { %1432 = vmatpush3.bf16.msra.mxu0 %v1519_v26  ;;  %v1547_v26 = vld [vmem:[%s1874_s5 + $0x20] ss:$8 sps:$4 sm:$0xff]  }
  0x32   : > { %1433 = vmatprep.subr.bf16.mxu0 %v1564_v24 }
  0x35   : > { %1434 = vmatpush3.bf16.msra.mxu0 %v1521_v28  ;;  %v1550_v28 = vld [vmem:[%s1874_s5 + $0x10] ss:$8 sps:$4 sm:$0xff]  }
  0x36   : > { %1435 = vmatprep.subr.bf16.mxu0 %v1564_v24 }
  0x39   : > { %1436 = vmatpush3.bf16.msra.mxu0 %v1523_v30  ;;  %v1553_v30 = vld [vmem:[%s1874_s5] ss:$8 sps:$4 sm:$0xff]  }
  0x3a   : > { %1453 = vmatprep.subr.bf16.mxu0 %v1564_v24 }
  0xec   : > { %v1364_v31 = vpop.f32.mrf.mxu0 }
  0xee   : > { %v1365_v33 = vpop.f32.mrf.mxu0 }
  0xef   : > { %v1366_v34 = vadd.f32 %v1365_v33, %v1364_v31  ;;  %v1566_v31 = vmov 0  }
  0xf0   : > { %v1367_v35 = vpop.f32.mrf.mxu0 }
  0xf1   : > { %v456_v36 = vadd.f32 %v1366_v34, %v1234_v32 }
  0xf2   : > { %v1368_v37 = vpop.f32.mrf.mxu0 }
  0xf3   : > { %v462_v38 = vmax.f32 %v456_v36, 0.0  ;;  %v1369_v39 = vadd.f32 %v1368_v37, %v1367_v35 }
  0xf5   : > { %469 = vst.msk [vmem:[#allocation2 + $0x3] sm:$0xff] %vm464_vm0, %v462_v38  ;;  %v459_v40 = vadd.f32 %v1369_v39, %v1234_v32 }
  0xf7   : > { %v463_v41 = vmax.f32 %v459_v40, 0.0 }
  0xf9   : > { %470 = vst.msk [vmem:[#allocation2 + $0xb] sm:$0xff] %vm464_vm0, %v463_v41 }
  0xfc   : > { %v482_v42 = vld [vmem:[#allocation2 + $0x1] sm:$0xff] }
  0xfd   : > { %v630_v46 = vld [vmem:[#allocation2 + $0x2] sm:$0xff] }
  0xfe   : > { %v471_v59 = vld [vmem:[#allocation2] sm:$0xff] }
  0xff   : > { %v712_v9 = vld [vmem:[#allocation2 + $0x3] sm:$0xff] }
 0x100   : > { %v483_v45 = vld [vmem:[#allocation2 + $0x9] sm:$0xff] }
 0x101   : > { %v631_v47 = vld [vmem:[#allocation2 + $0xa] sm:$0xff]  ;;  %v484_v48 = vpack.c.bf16 %v483_v45, %v482_v42 }
 0x102   : > { %v632_v49 = vpack.c.bf16 %v631_v47, %v630_v46  ;;  %v472_v56 = vld [vmem:[#allocation2 + $0x8] sm:$0xff] }
 0x103   : > { %1414 = vmatmul.mubr.msk.bf16.vlgmr.msra.gmra.mxu1 %vm464_vm0, %v484_v48  ;;  %v794_v57 = vld [vmem:[#allocation2 + $0x4] sm:$0xff]  ;;  %v795_v58 = vld [vmem:[#allocation2 + $0xc] sm:$0xff]  ;;  %v473_v62 = vpack.c.bf16 %v472_v56, %v471_v59 }
 0x104   : > { %1438 = vmatmul.mubr.msk.bf16.vlgmr.msra.gmra.mxu0 %vm464_vm0, %v632_v49  ;;  %1418 = vmatpush3.bf16.msra.mxu1 %v1524_v43  ;;  %v796_v63 = vpack.c.bf16 %v795_v58, %v794_v57  ;;  %v713_v6 = vld [vmem:[#allocation2 + $0xb] sm:$0xff] }
 0x105   : > { %1454 = vmatpush3.bf16.msra.mxu0 %v1525_v44  ;;  %1419 = vmatprep.subr.bf16.mxu1 %v1564_v24  ;;  %v958_v7 = vld [vmem:[#allocation2 + $0x6] sm:$0xff]  ;;  %v959_v8 = vld [vmem:[#allocation2 + $0xe] sm:$0xff]  ;;  %v714_v13 = vpack.c.bf16 %v713_v6, %v712_v9 }
 0x106   : > { %1455 = vmatprep.subr.bf16.mxu0 %v1564_v24  ;;  %1425 = vmatprep.mubr.msk.bf16.mxu1 %vm1565_vm2, %v1564_v24  ;;  %v960_v14 = vpack.c.bf16 %v959_v8, %v958_v7  ;;  %v876_v18 = vld [vmem:[#allocation2 + $0x5] sm:$0xff]  ;;  %v877_v21 = vld [vmem:[#allocation2 + $0xd] sm:$0xff] }
 0x107   : > { %1461 = vmatprep.mubr.msk.bf16.mxu0 %vm1565_vm2, %v1564_v24  ;;  %v878_v22 = vpack.c.bf16 %v877_v21, %v876_v18  ;;  %v1060_v21 = vld [vmem:[%s1875_s6] sm:$0x3] }
 0x108   : > { %1420 = vmatpush3.bf16.msra.mxu1 %v1526_v50 }
 0x109   : > { %1456 = vmatpush3.bf16.msra.mxu0 %v1527_v51  ;;  %1421 = vmatprep.subr.bf16.mxu1 %v1564_v24 }
 0x10a   : > { %1457 = vmatprep.subr.bf16.mxu0 %v1564_v24 }
 0x10c   : > { %1422 = vmatpush3.bf16.msra.mxu1 %v1528_v52 }
 0x10d   : > { %1458 = vmatpush3.bf16.msra.mxu0 %v1529_v53  ;;  %1423 = vmatprep.subr.bf16.mxu1 %v1564_v24 }
 0x10e   : > { %1459 = vmatprep.subr.bf16.mxu0 %v1564_v24 }
 0x110   : > { %1424 = vmatpush3.bf16.msra.mxu1 %v1530_v54 }
 0x111   : > { %1460 = vmatpush3.bf16.msra.mxu0 %v1531_v55  ;;  %1441 = vmatprep.subr.bf16.mxu1 %v1564_v24 }
 0x112   : > { %1477 = vmatprep.subr.bf16.mxu0 %v1564_v24 }
 0x113   : > { %1426 = vmatmul.mubr.msk.bf16.vlgmr.msra.gmra.mxu1 %vm464_vm0, %v473_v62 }
 0x114   : > { %1462 = vmatmul.mubr.msk.bf16.vlgmr.msra.gmra.mxu0 %vm464_vm0, %v796_v63  ;;  %1442 = vmatpush3.bf16.msra.mxu1 %v1532_v60 }
 0x115   : > { %1478 = vmatpush3.bf16.msra.mxu0 %v1533_v61  ;;  %1443 = vmatprep.subr.bf16.mxu1 %v1564_v24 }
 0x116   : > { %1479 = vmatprep.subr.bf16.mxu0 %v1564_v24  ;;  %1449 = vmatprep.mubr.msk.bf16.mxu1 %vm1565_vm2, %v1564_v24 }
 0x117   : > { %1485 = vmatprep.mubr.msk.bf16.mxu0 %vm1565_vm2, %v1564_v24 }
 0x118   : > { %1444 = vmatpush3.bf16.msra.mxu1 %v1534_v0 }
 0x119   : > { %1480 = vmatpush3.bf16.msra.mxu0 %v1535_v1  ;;  %1445 = vmatprep.subr.bf16.mxu1 %v1564_v24 }
 0x11a   : > { %1481 = vmatprep.subr.bf16.mxu0 %v1564_v24 }
 0x11c   : > { %1446 = vmatpush3.bf16.msra.mxu1 %v1536_v2 }
 0x11d   : > { %1482 = vmatpush3.bf16.msra.mxu0 %v1537_v3  ;;  %1447 = vmatprep.subr.bf16.mxu1 %v1564_v24 }
 0x11e   : > { %1483 = vmatprep.subr.bf16.mxu0 %v1564_v24 }
 0x120   : > { %1448 = vmatpush3.bf16.msra.mxu1 %v1538_v4  ;;  %v1334_v4 = vld [vmem:[%s1873_s4] ss:$0 sm:$0xff] }
 0x121   : > { %1484 = vmatpush3.bf16.msra.mxu0 %v1539_v5  ;;  %1465 = vmatprep.subr.bf16.mxu1 %v1564_v24 }
 0x123   : > { %1450 = vmatmul.mubr.msk.bf16.vlgmr.msra.gmra.mxu1 %vm464_vm0, %v714_v13 }
 0x124   : > { %1486 = vmatmul.mubr.msk.bf16.vlgmr.msra.gmra.mxu0 %vm464_vm0, %v960_v14  ;;  %1466 = vmatpush3.bf16.msra.mxu1 %v1540_v10 }
 0x125   : > { %1473 = vmatprep.mubr.msk.bf16.mxu1 %vm1565_vm2, %v1564_v24  ;;  %1467 = vmatprep.subr.bf16.mxu1 %v1564_v24 }
 0x128   : > { %1468 = vmatpush3.bf16.msra.mxu1 %v1541_v15 }
 0x129   : > { %1469 = vmatprep.subr.bf16.mxu1 %v1564_v24 }
 0x12c   : > { %1470 = vmatpush3.bf16.msra.mxu1 %v1542_v16  ;;  %v1062_v16 = vlaneseq }
 0x12d   : > { %1471 = vmatprep.subr.bf16.mxu1 %v1564_v24  ;;  %v1549_v24 = vld [vmem:[%s1874_s5 + $0x24] ss:$8 sps:$4 sm:$0xff]  }
 0x130   : > { %1472 = vmatpush3.bf16.msra.mxu1 %v1543_v17  ;;  %v1063_v17 = vshrl.u32 %v1062_v16, 7 }
 0x131   : > { %1123 = vmatprep.subr.bf16.mxu1 %v1546_v25 }
 0x132   : > { %v1064_v18 = vsub.s32 0, %v1063_v17 }
 0x133   : > { %1474 = vmatmul.mubr.msk.bf16.vlgmr.msra.gmra.mxu1 %vm464_vm0, %v878_v22  ;;  %v1068_v22 = vsub.s32 1, %v1063_v17 }
 0x134   : > { %1124 = vmatpush1.bf16.msra.mxu1 %v1544_v23  ;;  %1147 = vmatprep.mubr.bf16.mxu1 %v1566_v31  ;;  %v1065_v23 = vrot.slane %v1060_v21, %v1064_v18 }
 0x135   : > { %1125 = vmatprep.subr.bf16.mxu1 %v1549_v24  ;;  %v1069_v25 = vrot.slane %v1060_v21, %v1068_v22 }
 0x138   : > { %1126 = vmatpush1.bf16.msra.mxu1 %v1547_v26 }
 0x139   : > { %1127 = vmatprep.subr.bf16.mxu1 %v1552_v27 }
 0x13c   : > { %1128 = vmatpush1.bf16.msra.mxu1 %v1550_v28 }
 0x13d   : > { %1129 = vmatprep.subr.bf16.mxu1 %v1555_v29 }
 0x140   : > { %1130 = vmatpush1.bf16.msra.mxu1 %v1553_v30 }
 0x1c3   : > { %v555_v32 = vpop.f32.mrf.mxu1 }
 0x1c4   : > { %v703_v33 = vpop.f32.mrf.mxu0 }
 0x1c5   : > { %v1415_v34 = vpop.f32.mrf.mxu1 }
 0x1c6   : > { %v1439_v35 = vpop.f32.mrf.mxu0 }
 0x1c7   : > { %v558_v36 = vpop.f32.mrf.mxu1 }
 0x1c8   : > { %v706_v37 = vpop.f32.mrf.mxu0 }
 0x1c9   : > { %v1416_v38 = vpop.f32.mrf.mxu1 }
 0x1ca   : > { %v1440_v39 = vpop.f32.mrf.mxu0 }
 0x1d3   : > { %v623_v40 = vpop.f32.mrf.mxu1 }
 0x1d4   : > { %v867_v41 = vpop.f32.mrf.mxu0  ;;  %v624_v54 = vadd.f32 %v623_v40, %v555_v32 }
 0x1d5   : > { %v1427_v42 = vpop.f32.mrf.mxu1 }
 0x1d6   : > { %v1463_v43 = vpop.f32.mrf.mxu0  ;;  %v710_v58 = vadd.f32 %v703_v33, %v624_v54 }
 0x1d7   : > { %v626_v44 = vpop.f32.mrf.mxu1 }
 0x1d8   : > { %v870_v45 = vpop.f32.mrf.mxu0  ;;  %v627_v57 = vadd.f32 %v626_v44, %v558_v36 }
 0x1d9   : > { %v1428_v46 = vpop.f32.mrf.mxu1 }
 0x1da   : > { %v1464_v47 = vpop.f32.mrf.mxu0  ;;  %v711_v60 = vadd.f32 %v706_v37, %v627_v57 }
 0x1e3   : > { %v785_v48 = vpop.f32.mrf.mxu1 }
 0x1e4   : > { %v1031_v49 = vpop.f32.mrf.mxu0  ;;  %v792_v59 = vadd.f32 %v785_v48, %v710_v58 }
 0x1e5   : > { %v1451_v50 = vpop.f32.mrf.mxu1 }
 0x1e6   : > { %v1487_v51 = vpop.f32.mrf.mxu0  ;;  %v874_v62 = vadd.f32 %v867_v41, %v792_v59 }
 0x1e7   : > { %v788_v52 = vpop.f32.mrf.mxu1 }
 0x1e8   : > { %v1034_v53 = vpop.f32.mrf.mxu0  ;;  %v793_v61 = vadd.f32 %v788_v52, %v711_v60 }
 0x1e9   : > { %v1452_v55 = vpop.f32.mrf.mxu1 }
 0x1ea   : > { %v1488_v56 = vpop.f32.mrf.mxu0  ;;  %v875_v3 = vadd.f32 %v870_v45, %v793_v61 }
 0x1f3   : > { %v949_v63 = vpop.f32.mrf.mxu1 }
 0x1f4   : > { %v956_v0 = vadd.f32 %v949_v63, %v874_v62 }
 0x1f5   : > { %v1475_v1 = vpop.f32.mrf.mxu1 }
 0x1f6   : > { %v1038_v2 = vadd.f32 %v1031_v49, %v956_v0 }
 0x1f7   : > { %v952_v5 = vpop.f32.mrf.mxu1 }
 0x1f8   : > { %v957_v6 = vadd.f32 %v952_v5, %v875_v3  ;;  %v1047_v8 = vadd.f32 %v1334_v4, %v1038_v2 }
 0x1f9   : > { %v1476_v7 = vpop.f32.mrf.mxu1 }
 0x1fa   : > { %v1039_v9 = vadd.f32 %v1034_v53, %v957_v6  ;;  %v1049_v13 = vmax.f32 %v1047_v8, 0.0 }
 0x1fc   : > { %v1048_v10 = vadd.f32 %v1334_v4, %v1039_v9 }
 0x1fe   : > { %v1050_v14 = vmax.f32 %v1048_v10, 0.0 }
 0x200   : > { %v1051_v15 = vpack.c.bf16 %v1050_v14, %v1049_v13 }
 0x202   : > { %1343 = vmatmul.mubr.msk.bf16.vlgmr.msra.gmra.mxu1 %vm464_vm0, %v1051_v15 }
 0x2c2   : > { %v1149_v24 = vpop.f32.mrf.mxu1 }
 0x2c3   : > { %v1150_v26 = vadd.f32 %v1149_v24, %v1065_v23 }
 0x2c4   : > { %v1151_v27 = vpop.f32.mrf.mxu1 }
 0x2c5   : > { %v1158_v28 = vadd.f32 %v1150_v26, %v1677_v19  ;;  %v1152_v29 = vadd.f32 %v1151_v27, %v1069_v25 }
 0x2c6   : > { %v1153_v30 = vpop.f32.mrf.mxu1 }
 0x2c7   : > { %v1162_v31 = vmax.f32 %v1158_v28, 0.0  ;;  %v1159_v32 = vadd.f32 %v1152_v29, %v1656_v11  ;;  %v1154_v33 = vadd.f32 %v1153_v30, %v1065_v23 }
 0x2c8   : > { %v1155_v34 = vpop.f32.mrf.mxu1 }
 0x2c9   : > { %1166 = vst [vmem:[%s278_s19] sm:$0xff] %v1162_v31  ;;  %v1163_v35 = vmax.f32 %v1159_v32, 0.0  ;;  %v1160_v36 = vadd.f32 %v1154_v33, %v1679_v20  ;;  %v1156_v37 = vadd.f32 %v1155_v34, %v1069_v25 }
 0x2cb   : > { %1167 = vst [vmem:[%s278_s19 + $0x8] sm:$0xff] %v1163_v35  ;;  %v1164_v38 = vmax.f32 %v1160_v36, 0.0  ;;  %v1161_v19 = vadd.f32 %v1156_v37, %v1658_v12 }
 0x2cd   : > { %1168 = vst [vmem:[%s278_s19 + $0x10] sm:$0xff] %v1164_v38  ;;  %v1165_v39 = vmax.f32 %v1161_v19, 0.0 }
 0x2cf   : > { %1169 = vst [vmem:[%s278_s19 + $0x18] sm:$0xff] %v1165_v39 }
 0x2d0 PF: > { %s17_s24 = sadd.s32 1, %s1562_s24  }
 0x2d1   : > { %p14_p4 = scmp.ge.s32.totalorder %s17_s24, 4  }
 0x2d3   :  { %16 = sbr.rel (!%p14_p4) target bundleno = 1 (0x1), region = 84 }

</bundles_post_ra>
